<compile_context>
chip_gen: v5e
topology: v5e:2x2
jax: 0.10.0
libtpu: 0.0.40
codegen_flags: <defaults>
</compile_context>

<pallas_src>
import functools

import jax
import jax.numpy as jnp
from jax.experimental import pallas as pl
from jax.experimental.pallas import tpu as pltpu


# ---------------------------------------------------------------- kernel ----

def _brain_kernel(*refs, n_agg, n_heads, n_mid, k, hidden):
    """Fused forward:
         h     = Swish(Linear(.)) x n_agg                  (LinearEncoder)
         s_h   = HardSelector_h(h)        for every head   (top-k threshold crop)
         s_cat = [s_0 | s_1 | ...]                         (feature-stacked in VMEM scratch)
         s_cat = BlockDiagLinear(s_cat)   x n_mid
         y     = BlockDiagLinear(s_cat)  -> lane-packed [bt, sum(shape*ch)]
    """
    p = 0
    x_ref = refs[p]; p += 1
    agg = [(refs[p + 2 * i], refs[p + 2 * i + 1]) for i in range(n_agg)]
    p += 2 * n_agg
    fi_refs = [refs[p + i] for i in range(n_heads)]
    p += n_heads
    mids = [(refs[p + 2 * i], refs[p + 2 * i + 1]) for i in range(n_mid)]
    p += 2 * n_mid
    wfin_ref, bfin_ref = refs[p], refs[p + 1]; p += 2
    o_ref = refs[p]; p += 1
    s_scr = refs[p]                                   # VMEM scratch [bt, n_heads*hidden]

    # ---- LinearEncoder: (Linear + Swish) stack ----
    h = x_ref[...]
    for w_ref, b_ref in agg:
        h = jnp.dot(h, w_ref[...], preferred_element_type=jnp.float32) + b_ref[...]
        h = h * jax.nn.sigmoid(h)                     # Swish; sigmoid lands on the EUP slot

    # ---- HardSelector per head (exact torch.topk-threshold semantics, ties included) ----
    #   x[b,j] kept  <=>  w[b,j] > (k-th largest of w[b,:])  <=>  #{i: w[b,i] >= w[b,j]} < k
    def hard_select(fi_row):
        wgt = h * fi_row                                                  # [bt, H]
        ge = jnp.sum((wgt[:, None, :] >= wgt[:, :, None]).astype(jnp.float32),
                     axis=-1)                                             # [bt, H]
        return jnp.where(ge < float(k), h, jnp.zeros_like(h))

    for head in range(n_heads):
        s_scr[:, head * hidden:(head + 1) * hidden] = hard_select(fi_refs[head][...])
    s = s_scr[...]                                                        # [bt, n_heads*H]

    # ---- per-head Linear stacks fused as block-diagonal matmuls ----
    for w_ref, b_ref in mids:
        s = jnp.dot(s, w_ref[...], preferred_element_type=jnp.float32) + b_ref[...]
    y = jnp.dot(s, wfin_ref[...], preferred_element_type=jnp.float32) + bfin_ref[...]
    o_ref[...] = y.astype(o_ref.dtype)


# --------------------------------------------------------------- wrapper ----

def _block_diag(mats):
    rows = []
    for i, m in enumerate(mats):
        row = [m if j == i else jnp.zeros((m.shape[0], mats[j].shape[1]), m.dtype)
               for j in range(len(mats))]
        rows.append(jnp.concatenate(row, axis=1))
    return jnp.concatenate(rows, axis=0)


def build_brain_forward(agg_params, selector_params, *, hidden, k,
                        output_sizes, output_channels, batch_tile=512):
    """Returns forward(x) -> List[[B, ch, shape]] implemented as one fused pallas_call."""
    # torch.topk(k=0).values[:, -1] would error; keep the same precondition explicit.
    assert k >= 1, "selection_part must select at least one feature"
    n_agg = len(agg_params)
    n_heads = len(selector_params)
    n_mid = len(selector_params[0][1])
    out_dims = [s * c for s, c in zip(output_sizes, output_channels)]
    total_out = sum(out_dims)

    # Pack parameters once (weights are constants at inference time).
    packed = []
    for w, b in agg_params:
        packed += [w, b.reshape(1, -1)]
    for fi, _, _ in selector_params:
        packed.append(fi.reshape(1, -1))
    for j in range(n_mid):
        packed.append(_block_diag([selector_params[hd][1][j][0] for hd in range(n_heads)]))
        packed.append(jnp.concatenate([selector_params[hd][1][j][1]
                                       for hd in range(n_heads)]).reshape(1, -1))
    packed.append(_block_diag([selector_params[hd][2][0] for hd in range(n_heads)]))
    packed.append(jnp.concatenate([selector_params[hd][2][1]
                                   for hd in range(n_heads)]).reshape(1, -1))

    kernel = functools.partial(_brain_kernel, n_agg=n_agg, n_heads=n_heads,
                               n_mid=n_mid, k=k, hidden=hidden)

    def forward(x):
        batch, in_f = x.shape
        # Small batch: one grid step (grid is a serial loop on TPU, not a launch).
        # Large batch: tile rows, weights stay VMEM-resident, batch axis is "parallel".
        bt = batch if batch <= batch_tile else batch_tile
        grid = (pl.cdiv(batch, bt),)
        in_specs = [pl.BlockSpec((bt, in_f), lambda i: (i, 0))]
        in_specs += [pl.BlockSpec(p.shape, lambda i: (0, 0)) for p in packed]
        y = pl.pallas_call(
            kernel,
            out_shape=jax.ShapeDtypeStruct((batch, total_out), jnp.float32),
            grid=grid,
            in_specs=in_specs,
            out_specs=pl.BlockSpec((bt, total_out), lambda i: (i, 0)),
            scratch_shapes=[pltpu.VMEM((bt, n_heads * hidden), jnp.float32)],
            compiler_params=pltpu.CompilerParams(
                dimension_semantics=("parallel",)),
        )(x, *packed)
        outs, off = [], 0
        for d, ch in zip(out_dims, output_channels):
            outs.append(y[:, off:off + d].reshape(batch, ch, -1))   # .view(B, ch, -1)
            off += d
        return outs

    return forward


# ------------------------------------------------------------------- main ---

if __name__ == "__main__":
    batch = 4
    input_size = 16
    aggregation_layers = 2
    hidden_size = 32
    feature_selection_layers = 2
    output_sizes = [12, 8]
    output_channels = [3, 2]
    selection_part = int(0.3 * hidden_size)      # HardSelector(hidden, 0.3) -> k = 9

    root = jax.random.PRNGKey(0)
    keys = list(jax.random.split(root, 32))

    def take_key():
        return keys.pop(0)

    def init_linear(in_f, out_f):
        # deterministic synthetic init (Kaiming-ish scale), zero bias like ML-Agents linear_layer
        w = jax.random.normal(take_key(), (in_f, out_f), jnp.float32) / jnp.sqrt(float(in_f))
        b = jnp.zeros((out_f,), jnp.float32)
        return w, b

    # LinearEncoder(input_size, aggregation_layers, hidden_size): (Linear + Swish) stack.
    agg_params = [init_linear(input_size, hidden_size)]
    for _ in range(aggregation_layers - 1):
        agg_params.append(init_linear(hidden_size, hidden_size))

    # feature_selectors[i]: HardSelector -> (L-1) x Linear(h,h) -> Linear(h, shape*ch)
    selector_params = []
    for shape, ch in zip(output_sizes, output_channels):
        fi = jnp.ones((hidden_size,), jnp.float32)               # torch.ones init
        mids = [init_linear(hidden_size, hidden_size)
                for _ in range(feature_selection_layers - 1)]
        final = init_linear(hidden_size, shape * ch)
        selector_params.append((fi, mids, final))

    x = jax.random.normal(take_key(), (batch, input_size), jnp.float32)

    brain_forward = build_brain_forward(
        agg_params, selector_params, hidden=hidden_size, k=selection_part,
        output_sizes=output_sizes, output_channels=output_channels)

    # Pure-JAX reference (original, unpacked per-head weights; HIGHEST precision matmuls).
    def ref_forward(inp):
        hp = jax.lax.Precision.HIGHEST
        h = inp
        for w, b in agg_params:
            z = jnp.dot(h, w, precision=hp) + b
            h = z * jax.nn.sigmoid(z)
        outs = []
        for (fi, mids, (wf, bf)), ch in zip(selector_params, output_channels):
            wsel = h * fi
            thr = jax.lax.top_k(wsel, selection_part)[0][:, -1:]
            s = jnp.where(wsel > thr, h, 0.0)
            for w, b in mids:
                s = jnp.dot(s, w, precision=hp) + b
            y = jnp.dot(s, wf, precision=hp) + bf
            outs.append(y.reshape(inp.shape[0], ch, -1))
        return outs

    outs = jax.block_until_ready(brain_forward(x))
    refs = ref_forward(x)
    for o, r, shape, ch in zip(outs, refs, output_sizes, output_channels):
        assert o.shape == (batch, ch, shape), o.shape
        assert jnp.allclose(o, r, rtol=1e-3, atol=1e-3), float(jnp.max(jnp.abs(o - r)))
    print("KERNEL_OK")
</pallas_src>

<mosaic_0001>
module attributes {stable_mosaic.version = 11 : i64} {
  func.func @_brain_kernel(%arg0: i32, %arg1: memref<4x16xf32, #tpu.memory_space<vmem>>, %arg2: memref<16x32xf32, #tpu.memory_space<vmem>>, %arg3: memref<1x32xf32, #tpu.memory_space<vmem>>, %arg4: memref<32x32xf32, #tpu.memory_space<vmem>>, %arg5: memref<1x32xf32, #tpu.memory_space<vmem>>, %arg6: memref<1x32xf32, #tpu.memory_space<vmem>>, %arg7: memref<1x32xf32, #tpu.memory_space<vmem>>, %arg8: memref<64x64xf32, #tpu.memory_space<vmem>>, %arg9: memref<1x64xf32, #tpu.memory_space<vmem>>, %arg10: memref<64x52xf32, #tpu.memory_space<vmem>>, %arg11: memref<1x52xf32, #tpu.memory_space<vmem>>, %arg12: memref<4x52xf32, #tpu.memory_space<vmem>>, %arg13: memref<4x64xf32, #tpu.memory_space<vmem>>) attributes {dimension_semantics = [#tpu.dimension_semantics<parallel>], iteration_bounds = array<i64: 1>, scalar_prefetch = 0 : i64, scratch_operands = 1 : i64, tpu.core_type = #tpu.core_type<tc>, window_params = [{transform_indices = @transform_0, window_bounds = array<i64: 4, 16>}, {pipeline_mode = #tpu.pipeline_mode<synchronous>, transform_indices = @transform_1, window_bounds = array<i64: 16, 32>}, {pipeline_mode = #tpu.pipeline_mode<synchronous>, transform_indices = @transform_2, window_bounds = array<i64: 1, 32>}, {pipeline_mode = #tpu.pipeline_mode<synchronous>, transform_indices = @transform_3, window_bounds = array<i64: 32, 32>}, {pipeline_mode = #tpu.pipeline_mode<synchronous>, transform_indices = @transform_4, window_bounds = array<i64: 1, 32>}, {pipeline_mode = #tpu.pipeline_mode<synchronous>, transform_indices = @transform_5, window_bounds = array<i64: 1, 32>}, {pipeline_mode = #tpu.pipeline_mode<synchronous>, transform_indices = @transform_6, window_bounds = array<i64: 1, 32>}, {pipeline_mode = #tpu.pipeline_mode<synchronous>, transform_indices = @transform_7, window_bounds = array<i64: 64, 64>}, {pipeline_mode = #tpu.pipeline_mode<synchronous>, transform_indices = @transform_8, window_bounds = array<i64: 1, 64>}, {pipeline_mode = #tpu.pipeline_mode<synchronous>, transform_indices = @transform_9, window_bounds = array<i64: 64, 52>}, {pipeline_mode = #tpu.pipeline_mode<synchronous>, transform_indices = @transform_10, window_bounds = array<i64: 1, 52>}, {transform_indices = @transform_11, window_bounds = array<i64: 4, 52>}]} {
    %c0 = arith.constant 0 : index
    %c0_0 = arith.constant 0 : index
    %0 = vector.load %arg1[%c0, %c0_0] : memref<4x16xf32, #tpu.memory_space<vmem>>, vector<4x16xf32>
    %c0_1 = arith.constant 0 : index
    %c0_2 = arith.constant 0 : index
    %1 = vector.load %arg2[%c0_1, %c0_2] : memref<16x32xf32, #tpu.memory_space<vmem>>, vector<16x32xf32>
    %cst = arith.constant dense<0.000000e+00> : vector<4x32xf32>
    %2 = tpu.matmul %0, %1, %cst {dimension_numbers = #tpu.dot_dimension_numbers<[1], [0], [0], [1], [0, 0, 1, 1], [], []>} : vector<4x16xf32>, vector<16x32xf32>, vector<4x32xf32> -> vector<4x32xf32>
    %c0_3 = arith.constant 0 : index
    %c0_4 = arith.constant 0 : index
    %3 = vector.load %arg3[%c0_3, %c0_4] : memref<1x32xf32, #tpu.memory_space<vmem>>, vector<1x32xf32>
    %4 = vector.broadcast %3 : vector<1x32xf32> to vector<4x32xf32>
    %5 = arith.addf %2, %4 : vector<4x32xf32>
    %6 = arith.negf %5 : vector<4x32xf32>
    %7 = math.exp %6 : vector<4x32xf32>
    %cst_5 = arith.constant 1.000000e+00 : f32
    %8 = vector.broadcast %cst_5 : f32 to vector<4x32xf32>
    %9 = arith.addf %8, %7 : vector<4x32xf32>
    %10 = arith.divf %8, %9 : vector<4x32xf32>
    %11 = arith.mulf %5, %10 : vector<4x32xf32>
    %c0_6 = arith.constant 0 : index
    %c0_7 = arith.constant 0 : index
    %12 = vector.load %arg4[%c0_6, %c0_7] : memref<32x32xf32, #tpu.memory_space<vmem>>, vector<32x32xf32>
    %cst_8 = arith.constant dense<0.000000e+00> : vector<4x32xf32>
    %13 = tpu.matmul %11, %12, %cst_8 {dimension_numbers = #tpu.dot_dimension_numbers<[1], [0], [0], [1], [0, 0, 1, 1], [], []>} : vector<4x32xf32>, vector<32x32xf32>, vector<4x32xf32> -> vector<4x32xf32>
    %c0_9 = arith.constant 0 : index
    %c0_10 = arith.constant 0 : index
    %14 = vector.load %arg5[%c0_9, %c0_10] : memref<1x32xf32, #tpu.memory_space<vmem>>, vector<1x32xf32>
    %15 = vector.broadcast %14 : vector<1x32xf32> to vector<4x32xf32>
    %16 = arith.addf %13, %15 : vector<4x32xf32>
    %17 = arith.negf %16 : vector<4x32xf32>
    %18 = math.exp %17 : vector<4x32xf32>
    %cst_11 = arith.constant 1.000000e+00 : f32
    %19 = vector.broadcast %cst_11 : f32 to vector<4x32xf32>
    %20 = arith.addf %19, %18 : vector<4x32xf32>
    %21 = arith.divf %19, %20 : vector<4x32xf32>
    %22 = arith.mulf %16, %21 : vector<4x32xf32>
    %c0_12 = arith.constant 0 : index
    %c0_13 = arith.constant 0 : index
    %23 = vector.load %arg6[%c0_12, %c0_13] : memref<1x32xf32, #tpu.memory_space<vmem>>, vector<1x32xf32>
    %24 = vector.broadcast %23 : vector<1x32xf32> to vector<4x32xf32>
    %25 = arith.mulf %22, %24 : vector<4x32xf32>
    %26 = vector.shape_cast %25 : vector<4x32xf32> to vector<4x1x32xf32>
    %27 = vector.shape_cast %25 : vector<4x32xf32> to vector<4x32x1xf32>
    %28 = vector.broadcast %26 : vector<4x1x32xf32> to vector<4x32x32xf32>
    %29 = vector.broadcast %27 : vector<4x32x1xf32> to vector<4x32x32xf32>
    %30 = arith.cmpf oge, %28, %29 : vector<4x32x32xf32>
    %31 = arith.extui %30 : vector<4x32x32xi1> to vector<4x32x32xi32>
    %32 = arith.sitofp %31 : vector<4x32x32xi32> to vector<4x32x32xf32>
    %cst_14 = arith.constant dense<0.000000e+00> : vector<4x32xf32>
    %33 = vector.multi_reduction <add>, %32, %cst_14 [2] : vector<4x32x32xf32> to vector<4x32xf32>
    %cst_15 = arith.constant 9.000000e+00 : f32
    %34 = vector.broadcast %cst_15 : f32 to vector<4x32xf32>
    %35 = arith.cmpf olt, %33, %34 : vector<4x32xf32>
    %cst_16 = arith.constant 0.000000e+00 : f32
    %36 = vector.broadcast %cst_16 : f32 to vector<4x32xf32>
    %37 = arith.select %35, %22, %36 : vector<4x32xi1>, vector<4x32xf32>
    %c0_17 = arith.constant 0 : index
    %c0_18 = arith.constant 0 : index
    %38 = vector.load %arg13[%c0_17, %c0_18] : memref<4x64xf32, #tpu.memory_space<vmem>>, vector<4x32xf32>
    tpu.vector_store %arg13[%c0_17, %c0_18], %37 {strides = array<i32>} : memref<4x64xf32, #tpu.memory_space<vmem>>, vector<4x32xf32>,
    %c0_19 = arith.constant 0 : index
    %c0_20 = arith.constant 0 : index
    %39 = vector.load %arg7[%c0_19, %c0_20] : memref<1x32xf32, #tpu.memory_space<vmem>>, vector<1x32xf32>
    %40 = vector.broadcast %39 : vector<1x32xf32> to vector<4x32xf32>
    %41 = arith.mulf %22, %40 : vector<4x32xf32>
    %42 = vector.shape_cast %41 : vector<4x32xf32> to vector<4x1x32xf32>
    %43 = vector.shape_cast %41 : vector<4x32xf32> to vector<4x32x1xf32>
    %44 = vector.broadcast %42 : vector<4x1x32xf32> to vector<4x32x32xf32>
    %45 = vector.broadcast %43 : vector<4x32x1xf32> to vector<4x32x32xf32>
    %46 = arith.cmpf oge, %44, %45 : vector<4x32x32xf32>
    %47 = arith.extui %46 : vector<4x32x32xi1> to vector<4x32x32xi32>
    %48 = arith.sitofp %47 : vector<4x32x32xi32> to vector<4x32x32xf32>
    %cst_21 = arith.constant dense<0.000000e+00> : vector<4x32xf32>
    %49 = vector.multi_reduction <add>, %48, %cst_21 [2] : vector<4x32x32xf32> to vector<4x32xf32>
    %cst_22 = arith.constant 9.000000e+00 : f32
    %50 = vector.broadcast %cst_22 : f32 to vector<4x32xf32>
    %51 = arith.cmpf olt, %49, %50 : vector<4x32xf32>
    %cst_23 = arith.constant 0.000000e+00 : f32
    %52 = vector.broadcast %cst_23 : f32 to vector<4x32xf32>
    %53 = arith.select %51, %22, %52 : vector<4x32xi1>, vector<4x32xf32>
    %c0_24 = arith.constant 0 : index
    %c32 = arith.constant 32 : index
    %54 = vector.load %arg13[%c0_24, %c32] : memref<4x64xf32, #tpu.memory_space<vmem>>, vector<4x32xf32>
    tpu.vector_store %arg13[%c0_24, %c32], %53 {strides = array<i32>} : memref<4x64xf32, #tpu.memory_space<vmem>>, vector<4x32xf32>,
    %c0_25 = arith.constant 0 : index
    %c0_26 = arith.constant 0 : index
    %55 = vector.load %arg13[%c0_25, %c0_26] : memref<4x64xf32, #tpu.memory_space<vmem>>, vector<4x64xf32>
    %c0_27 = arith.constant 0 : index
    %c0_28 = arith.constant 0 : index
    %56 = vector.load %arg8[%c0_27, %c0_28] : memref<64x64xf32, #tpu.memory_space<vmem>>, vector<64x64xf32>
    %cst_29 = arith.constant dense<0.000000e+00> : vector<4x64xf32>
    %57 = tpu.matmul %55, %56, %cst_29 {dimension_numbers = #tpu.dot_dimension_numbers<[1], [0], [0], [1], [0, 0, 1, 1], [], []>} : vector<4x64xf32>, vector<64x64xf32>, vector<4x64xf32> -> vector<4x64xf32>
    %c0_30 = arith.constant 0 : index
    %c0_31 = arith.constant 0 : index
    %58 = vector.load %arg9[%c0_30, %c0_31] : memref<1x64xf32, #tpu.memory_space<vmem>>, vector<1x64xf32>
    %59 = vector.broadcast %58 : vector<1x64xf32> to vector<4x64xf32>
    %60 = arith.addf %57, %59 : vector<4x64xf32>
    %c0_32 = arith.constant 0 : index
    %c0_33 = arith.constant 0 : index
    %61 = vector.load %arg10[%c0_32, %c0_33] : memref<64x52xf32, #tpu.memory_space<vmem>>, vector<64x52xf32>
    %cst_34 = arith.constant dense<0.000000e+00> : vector<4x52xf32>
    %62 = tpu.matmul %60, %61, %cst_34 {dimension_numbers = #tpu.dot_dimension_numbers<[1], [0], [0], [1], [0, 0, 1, 1], [], []>} : vector<4x64xf32>, vector<64x52xf32>, vector<4x52xf32> -> vector<4x52xf32>
    %c0_35 = arith.constant 0 : index
    %c0_36 = arith.constant 0 : index
    %63 = vector.load %arg11[%c0_35, %c0_36] : memref<1x52xf32, #tpu.memory_space<vmem>>, vector<1x52xf32>
    %64 = vector.broadcast %63 : vector<1x52xf32> to vector<4x52xf32>
    %65 = arith.addf %62, %64 : vector<4x52xf32>
    %c0_37 = arith.constant 0 : index
    %c0_38 = arith.constant 0 : index
    %66 = vector.load %arg12[%c0_37, %c0_38] : memref<4x52xf32, #tpu.memory_space<vmem>>, vector<4x52xf32>
    tpu.vector_store %arg12[%c0_37, %c0_38], %65 {strides = array<i32>} : memref<4x52xf32, #tpu.memory_space<vmem>>, vector<4x52xf32>,
    return
  }
  func.func @transform_0(%arg0: i32) -> (i32, i32) {
    %c0_i32 = arith.constant 0 : i32
    %c0_i32_0 = arith.constant 0 : i32
    return %arg0, %c0_i32 : i32, i32
  }
  func.func @transform_1(%arg0: i32) -> (i32, i32) {
    %c0_i32 = arith.constant 0 : i32
    %c0_i32_0 = arith.constant 0 : i32
    %c0_i32_1 = arith.constant 0 : i32
    return %c0_i32, %c0_i32_0 : i32, i32
  }
  func.func @transform_2(%arg0: i32) -> (i32, i32) {
    %c0_i32 = arith.constant 0 : i32
    %c0_i32_0 = arith.constant 0 : i32
    %c0_i32_1 = arith.constant 0 : i32
    return %c0_i32, %c0_i32_0 : i32, i32
  }
  func.func @transform_3(%arg0: i32) -> (i32, i32) {
    %c0_i32 = arith.constant 0 : i32
    %c0_i32_0 = arith.constant 0 : i32
    %c0_i32_1 = arith.constant 0 : i32
    return %c0_i32, %c0_i32_0 : i32, i32
  }
  func.func @transform_4(%arg0: i32) -> (i32, i32) {
    %c0_i32 = arith.constant 0 : i32
    %c0_i32_0 = arith.constant 0 : i32
    %c0_i32_1 = arith.constant 0 : i32
    return %c0_i32, %c0_i32_0 : i32, i32
  }
  func.func @transform_5(%arg0: i32) -> (i32, i32) {
    %c0_i32 = arith.constant 0 : i32
    %c0_i32_0 = arith.constant 0 : i32
    %c0_i32_1 = arith.constant 0 : i32
    return %c0_i32, %c0_i32_0 : i32, i32
  }
  func.func @transform_6(%arg0: i32) -> (i32, i32) {
    %c0_i32 = arith.constant 0 : i32
    %c0_i32_0 = arith.constant 0 : i32
    %c0_i32_1 = arith.constant 0 : i32
    return %c0_i32, %c0_i32_0 : i32, i32
  }
  func.func @transform_7(%arg0: i32) -> (i32, i32) {
    %c0_i32 = arith.constant 0 : i32
    %c0_i32_0 = arith.constant 0 : i32
    %c0_i32_1 = arith.constant 0 : i32
    return %c0_i32, %c0_i32_0 : i32, i32
  }
  func.func @transform_8(%arg0: i32) -> (i32, i32) {
    %c0_i32 = arith.constant 0 : i32
    %c0_i32_0 = arith.constant 0 : i32
    %c0_i32_1 = arith.constant 0 : i32
    return %c0_i32, %c0_i32_0 : i32, i32
  }
  func.func @transform_9(%arg0: i32) -> (i32, i32) {
    %c0_i32 = arith.constant 0 : i32
    %c0_i32_0 = arith.constant 0 : i32
    %c0_i32_1 = arith.constant 0 : i32
    return %c0_i32, %c0_i32_0 : i32, i32
  }
  func.func @transform_10(%arg0: i32) -> (i32, i32) {
    %c0_i32 = arith.constant 0 : i32
    %c0_i32_0 = arith.constant 0 : i32
    %c0_i32_1 = arith.constant 0 : i32
    return %c0_i32, %c0_i32_0 : i32, i32
  }
  func.func @transform_11(%arg0: i32) -> (i32, i32) {
    %c0_i32 = arith.constant 0 : i32
    %c0_i32_0 = arith.constant 0 : i32
    return %arg0, %c0_i32 : i32, i32
  }
}

</mosaic_0001>

<bundles_post_ra>
// kernel: tpu_custom_call.1
= control target key start
LH: loop header
LB: loop body
LE: loop exit
PB: predicated region body
PF: predicated region fallthrough
CT: control target
= control target key end

     0   :  { %vm46_vm0 = vcmask 130048   ;;  %s1765_s0 = inlined_call_operand.vmem [shape: f32[4,16], index: 0, kind: input, shape index: {}]   ;;  %s1766_s1 = inlined_call_operand.vmem [shape: f32[16,32], index: 1, kind: input, shape index: {}]   ;;  %s1767_s2 = inlined_call_operand.vmem [shape: f32[1,32], index: 2, kind: input, shape index: {}]   ;;  %s1768_s3 = inlined_call_operand.vmem [shape: f32[32,32], index: 3, kind: input, shape index: {}]   ;;  %s1769_s4 = inlined_call_operand.vmem [shape: f32[1,32], index: 4, kind: input, shape index: {}]   ;;  %s1770_s5 = inlined_call_operand.vmem [shape: f32[1,32], index: 5, kind: input, shape index: {}]   ;;  %s1771_s6 = inlined_call_operand.vmem [shape: f32[1,32], index: 6, kind: input, shape index: {}]   ;;  %s1772_s7 = inlined_call_operand.vmem [shape: f32[64,64], index: 7, kind: input, shape index: {}]   ;;  %s1773_s8 = inlined_call_operand.vmem [shape: f32[1,64], index: 8, kind: input, shape index: {}]   ;;  %s1774_s9 = inlined_call_operand.vmem [shape: f32[64,52], index: 9, kind: input, shape index: {}]   ;;  %s1775_s10 = inlined_call_operand.vmem [shape: f32[1,52], index: 10, kind: input, shape index: {}]   ;;  %s1776_s11 = inlined_call_operand.hbm [shape: f32[4,52], index: 11, kind: output, shape index: {}]  }
   0x1   :  { %v41_v0 = vld [vmem:[%s1766_s1 + $0x8] sm:$0xff]  ;;  %v40_v1 = vld [vmem:[%s1766_s1] sm:$0xff] }
   0x2   :  { %v39_v2 = vld [vmem:[%s1765_s0] sm:$0xf]  ;;  %64 = vmatpush.msra.mxu0 %v41_v0 }
   0x4   :  { %65 = vmatpush.msra.mxu0 %v40_v1 }
   0x5   :  { %16 = vsyncpa [#allocation4], 0  ;;  %1053 = vmatmul.msk.f32.vlgmr.msra.gmra.mxu0 %vm46_vm0, %v39_v2  ;;  %v93_v3 = vld [vmem:[%s1768_s3 + $0x18] sm:$0xff]  ;;  %v92_v4 = vld [vmem:[%s1768_s3 + $0x10] sm:$0xff]  ;;  %vm98_vm5 = vcmask 261120   ;;  %v152_v24 = vlaneseq  ;;  %s1183_s22 = smov [#allocation3]  }
   0x6   :  { %114 = vmatpush.msra.mxu1 %v93_v3  ;;  %v1141_v5 = vld [vmem:[%s1767_s2] ss:$0 sm:$0xff]  ;;  %v91_v6 = vld [vmem:[%s1768_s3 + $0x8] sm:$0xff]  ;;  %s1042_s23 = sshll.u32 %s1183_s22, 4  ;;  %s1044_s26 = sshll.u32 %s1776_s11, 4  ;;  %s1043_s23 = int_to_ptr.vmem [resolvable:$true] %s1042_s23  ;;  %s1045_s26 = int_to_ptr.hbm [resolvable:$true] %s1044_s26 }
   0x7   :  { %v90_v7 = vld [vmem:[%s1768_s3] sm:$0xff]  ;;  %v1270_v25 = vshrl.u32 %v152_v24, 7 }
   0x8   :  { %115 = vmatpush.msra.mxu1 %v92_v4  ;;  %v1142_v28 = vld [vmem:[%s1769_s4] ss:$0 sm:$0xff] }
   0x9   :  { %1094 = vset.pattern.permute.xlu1 %v1270_v25  ;;  %v1274_v26 = vadd.s32 16, %v1270_v25  ;;  %v1277_v27 = vadd.s32 8, %v1270_v25  ;;  %v1288_v46 = vadd.s32 24, %v1270_v25  ;;  %v1143_v50 = vld [vmem:[%s1770_s5] ss:$0 sm:$0xff] }
   0xa   :  { %116 = vmatpush.msra.mxu1 %v91_v6  ;;  %v1144_v55 = vld [vmem:[%s1771_s6] ss:$0 sm:$0xff] }
   0xb   :  { %1096 = vset.pattern.permute.xlu0 %v1274_v26  ;;  %1095 = vset.pattern.permute.xlu2 %v1277_v27 }
   0xc   :  { %117 = vmatpush.msra.mxu1 %v90_v7 }
  0x82   :  { %v67_v8 = vpop.f32.mrf.mxu0 }
  0x83   :  { %v68_v9 = vadd.f32 %v1141_v5, %v67_v8 }
  0x85   :  { %v1054_v10 = vmul.f32 -1.442695, %v68_v9 }
  0x87   :  { %1147 = vpow2.f32 %v1054_v10 }
  0x8d   :  { %v1148_v11 = vpop.eup %1147 }
  0x8e   :  { %v73_v12 = vadd.f32 1.0, %v1148_v11 }
  0x90   :  { %1149 = vrcp.f32 %v73_v12  ;;  %v85_v16 = vand.u32 2147483648, %v73_v12  ;;  %v83_v18 = vand.u32 2147483647, %v73_v12  ;;  %vm79_vm2 = vweird.f32 %v73_v12 }
  0x92   :  { %v86_v20 = vor.u32 1.1754944e-38, %v85_v16  ;;  %vm84_vm4 = vcmp.eq.f32.partialorder %v83_v18, 8.507059e+37  ;;  %v1181_v18 = vmov 0.0  }
  0x96   :  { %v1150_v13 = vpop.eup %1149 }
  0x97   :  { %v75_v14 = vmul.f32 %v1150_v13, %v73_v12  ;;  %vm80_vm1 = vweird.f32 %v1150_v13 }
  0x98   :  { %vm81_vm3 = vmor %vm79_vm2, %vm80_vm1 }
  0x99   :  { %v76_v15 = vsub.f32 1.0, %v75_v14 }
  0x9b   :  { %v77_v17 = vmul.f32 %v1150_v13, %v76_v15 }
  0x9d   :  { %v78_v19 = vadd.f32 %v1150_v13, %v77_v17 }
  0x9f   :  { %v82_v21 = vsel %vm81_vm3, %v1150_v13, %v78_v19 }
  0xa0   :  { %v87_v22 = vsel %vm84_vm4, %v86_v20, %v82_v21 }
  0xa1   :  { %v89_v23 = vmul.f32 %v87_v22, %v68_v9 }
  0xa3   :  { %1055 = vmatmul.msk.f32.vlgmr.msra.gmra.mxu1 %vm98_vm5, %v89_v23 }
 0x120   :  { %v119_v29 = vpop.f32.mrf.mxu1 }
 0x121   :  { %v120_v30 = vadd.f32 %v1142_v28, %v119_v29 }
 0x123   :  { %v1056_v31 = vmul.f32 -1.442695, %v120_v30 }
 0x125   :  { %1151 = vpow2.f32 %v1056_v31 }
 0x12b   :  { %v1152_v32 = vpop.eup %1151 }
 0x12c   :  { %v125_v33 = vadd.f32 1.0, %v1152_v32 }
 0x12e   :  { %1153 = vrcp.f32 %v125_v33  ;;  %v137_v37 = vand.u32 2147483648, %v125_v33  ;;  %v135_v39 = vand.u32 2147483647, %v125_v33  ;;  %vm131_vm7 = vweird.f32 %v125_v33 }
 0x130   :  { %v138_v41 = vor.u32 1.1754944e-38, %v137_v37  ;;  %vm136_vm9 = vcmp.eq.f32.partialorder %v135_v39, 8.507059e+37 }
 0x134   :  { %v1154_v34 = vpop.eup %1153 }
 0x135   :  { %v127_v35 = vmul.f32 %v1154_v34, %v125_v33  ;;  %vm132_vm6 = vweird.f32 %v1154_v34 }
 0x136   :  { %vm133_vm8 = vmor %vm131_vm7, %vm132_vm6 }
 0x137   :  { %v128_v36 = vsub.f32 1.0, %v127_v35 }
 0x139   :  { %v129_v38 = vmul.f32 %v1154_v34, %v128_v36 }
 0x13b   :  { %v130_v40 = vadd.f32 %v1154_v34, %v129_v38 }
 0x13d   :  { %v134_v42 = vsel %vm133_vm8, %v1154_v34, %v130_v40 }
 0x13e   :  { %v139_v43 = vsel %vm136_vm9, %v138_v41, %v134_v42 }
 0x13f   :  { %v1284_v44 = vmul.f32 %v139_v43, %v120_v30 }
 0x141   :  { %v372_v45 = vperm.slane %v1284_v44, 0  ;;  %v422_v47 = vperm.slane %v1284_v44, 2  ;;  %v397_v48 = vperm.slane %v1284_v44, 1  ;;  %v447_v49 = vperm.slane %v1284_v44, 3 }
 0x142   :  { %v1309_v51 = vmul.f32 %v1143_v50, %v1284_v44  ;;  %v1339_v58 = vmul.f32 %v1144_v55, %v1284_v44 }
 0x143   :  { %389 = vperm.xlu0 %1096, %v372_v45   ;;  %383 = vperm.xlu2 %1095, %v372_v45  }
 0x144   :  { %377 = vperm.xlu1 %1094, %v372_v45   ;;  %v1312_v52 = vperm.slane %v1309_v51, 0  ;;  %v176_v53 = vperm.slane %v1309_v51, 1  ;;  %v201_v54 = vperm.slane %v1309_v51, 2  ;;  %v226_v56 = vperm.slane %v1309_v51, 3 }
 0x145   :  { %v1342_v59 = vperm.slane %v1339_v58, 0  ;;  %v1353_v62 = vperm.slane %v1339_v58, 2  ;;  %v1359_v0 = vperm.slane %v1339_v58, 3  ;;  %v647_v3 = vperm.slane %v1339_v58, 1 }
 0x146   :  { %v148_v6 = vrot.slane %v1309_v51, 1  ;;  %v149_v23 = vrot.slane %v1309_v51, 2  ;;  %v150_v34 = vrot.slane %v1309_v51, 3  ;;  %v620_v50 = vrot.slane %v1339_v58, 2 }
 0x148   :  { %v1380_v8 = vperm.slane %v148_v6, 0  ;;  %v1421_v28 = vperm.slane %v149_v23, 0  ;;  %v1440_v36 = vperm.slane %v150_v34, 0 }
 0x14b   :  { %1103 = vset.pattern.permute.xlu0 %v1277_v27  ;;  %1098 = vset.pattern.permute.xlu2 %v1270_v25 }
 0x14c   :  { %1097 = vset.pattern.permute.xlu1 %v1288_v46 }
 0x153   :  { %433 = vperm.xlu0 %1103, %v422_v47   ;;  %402 = vperm.xlu2 %1098, %v397_v48  }
 0x154   :  { %395 = vperm.xlu1 %1097, %v372_v45  }
 0x15b   :  { %1105 = vset.pattern.permute.xlu0 %v1270_v25  ;;  %1100 = vset.pattern.permute.xlu2 %v1274_v26 }
 0x15c   :  { %1099 = vset.pattern.permute.xlu1 %v1277_v27 }
 0x163   :  { %452 = vperm.xlu0 %1105, %v447_v49   ;;  %414 = vperm.xlu2 %1100, %v397_v48  }
 0x164   :  { %408 = vperm.xlu1 %1099, %v397_v48  }
 0x16b   :  { %1106 = vset.pattern.permute.xlu0 %v1277_v27  ;;  %1102 = vset.pattern.permute.xlu2 %v1270_v25 }
 0x16c   :  { %1101 = vset.pattern.permute.xlu1 %v1288_v46 }
 0x173   :  { %458 = vperm.xlu0 %1106, %v447_v49   ;;  %427 = vperm.xlu2 %1102, %v422_v47  }
 0x174   :  { %420 = vperm.xlu1 %1101, %v397_v48  }
 0x17b   :  { %1108 = vset.pattern.permute.xlu0 %v1274_v26  ;;  %1107 = vset.pattern.permute.xlu2 %v1288_v46 }
 0x17c   :  { %1104 = vset.pattern.permute.xlu1 %v1274_v26 }
 0x183   :  { %464 = vperm.xlu0 %1108, %v447_v49   ;;  %445 = vperm.xlu2 %1107, %v422_v47  }
 0x184   :  { %439 = vperm.xlu1 %1104, %v422_v47  }
 0x18b   :  { %1109 = vset.pattern.permute.xlu0 %v1270_v25  ;;  %470 = vperm.xlu2 %1107, %v447_v49  }
 0x18c   :  { %168 = vperm.xlu1 %1104, %v1312_v52  }
 0x193   :  { %1112 = vset.pattern.permute.xlu2 %v1270_v25  ;;  %156 = vperm.xlu0 %1109, %v1312_v52  }
 0x194   :  { %1111 = vset.pattern.permute.xlu1 %v1288_v46 }
 0x19b   :  { %181 = vperm.xlu2 %1112, %v176_v53   ;;  %1110 = vset.pattern.permute.xlu0 %v1277_v27 }
 0x19c   :  { %174 = vperm.xlu1 %1111, %v1312_v52  }
 0x19d   :  { %v1334_v57 = vpop.permute.xlu2 %383 }
 0x1a3   :  { %1113 = vset.pattern.permute.xlu2 %v1277_v27  ;;  %162 = vperm.xlu0 %1110, %v1312_v52  }
 0x1a4   :  { %1114 = vset.pattern.permute.xlu1 %v1274_v26 }
 0x1ab   :  { %187 = vperm.xlu2 %1113, %v176_v53   ;;  %1116 = vset.pattern.permute.xlu0 %v1270_v25 }
 0x1ac   :  { %193 = vperm.xlu1 %1114, %v176_v53  }
 0x1ad   :  { %v1344_v60 = vpop.permute.xlu2 %402 }
 0x1b3   :  { %1115 = vset.pattern.permute.xlu2 %v1288_v46  ;;  %206 = vperm.xlu0 %1116, %v201_v54  }
 0x1b4   :  { %1117 = vset.pattern.permute.xlu1 %v1277_v27 }
 0x1b5   :  { %v1399_v13 = vpop.permute.xlu0 %389 }
 0x1b6   :  { %v1365_v2 = vpop.permute.xlu1 %377 }
 0x1bb   :  { %199 = vperm.xlu2 %1115, %v176_v53   ;;  %1121 = vset.pattern.permute.xlu0 %v1277_v27 }
 0x1bc   :  { %212 = vperm.xlu1 %1117, %v201_v54  }
 0x1bd   :  { %v1347_v61 = vpop.permute.xlu2 %414 }
 0x1c3   :  { %1118 = vset.pattern.permute.xlu2 %v1274_v26  ;;  %237 = vperm.xlu0 %1121, %v226_v56  }
 0x1c4   :  { %1119 = vset.pattern.permute.xlu1 %v1288_v46 }
 0x1c5   :  { %v1405_v16 = vpop.permute.xlu0 %433 }
 0x1c6   :  { %v1370_v4 = vpop.permute.xlu1 %395 }
 0x1cb   :  { %218 = vperm.xlu2 %1118, %v201_v54   ;;  %633 = vperm.xlu0 %1121, %v1342_v59  }
 0x1cc   :  { %224 = vperm.xlu1 %1119, %v201_v54  }
 0x1cd   :  { %v1355_v63 = vpop.permute.xlu2 %427 }
 0x1d3   :  { %1120 = vset.pattern.permute.xlu2 %v1270_v25  ;;  %1129 = vset.pattern.permute.xlu0 %v1270_v25 }
 0x1d4   :  { %1122 = vset.pattern.permute.xlu1 %v1274_v26 }
 0x1d5   :  { %v1414_v21 = vpop.permute.xlu0 %452 }
 0x1d6   :  { %v1377_v7 = vpop.permute.xlu1 %408 }
 0x1db   :  { %231 = vperm.xlu2 %1120, %v226_v56   ;;  %677 = vperm.xlu0 %1129, %v1353_v62  }
 0x1dc   :  { %243 = vperm.xlu1 %1122, %v226_v56  }
 0x1dd   :  { %v1361_v1 = vpop.permute.xlu2 %445 }
 0x1e3   :  { %1123 = vset.pattern.permute.xlu2 %v1288_v46  ;;  %702 = vperm.xlu0 %1129, %v1359_v0  }
 0x1e4   :  { %1125 = vset.pattern.permute.xlu1 %v1270_v25 }
 0x1e5   :  { %v1372_v5 = vpop.permute.xlu2 %470  ;;  %v1426_v31 = vpop.permute.xlu0 %458 }
 0x1e6   :  { %v1387_v10 = vpop.permute.xlu1 %420 }
 0x1eb   :  { %249 = vperm.xlu2 %1123, %v226_v56   ;;  %1136 = vset.pattern.permute.xlu0 %v1274_v26  ;;  %v1467_v56 = vperm.slane %v620_v50, 0 }
 0x1ec   :  { %652 = vperm.xlu1 %1125, %v647_v3  }
 0x1f3   :  { %1124 = vset.pattern.permute.xlu2 %v1270_v25  ;;  %714 = vperm.xlu0 %1136, %v1359_v0  }
 0x1f4   :  { %1127 = vset.pattern.permute.xlu1 %v1274_v26 }
 0x1f5   :  { %v1382_v9 = vpop.permute.xlu2 %181  ;;  %v1432_v32 = vpop.permute.xlu0 %464 }
 0x1f6   :  { %vm263_vm10 = vcmp.ge.f32.partialorder %v1380_v8, %v1382_v9  ;;  %v1391_v11 = vpop.permute.xlu1 %439 }
 0x1fb   :  { %627 = vperm.xlu2 %1124, %v1342_v59  }
 0x1fc   :  { %639 = vperm.xlu1 %1127, %v1342_v59  }
 0x1fe   :  { %v169_v14 = vpop.permute.xlu1 %168 }
 0x1ff   :  { %vm261_vm12 = vcmp.ge.f32.partialorder %v1312_v52, %v169_v14 }
 0x200   :  { %v1059_v19 = vsel %vm261_vm12, 1.0, %v1181_v18 }
 0x201   :  { %v313_v20 = vsel %vm98_vm5, %v1059_v19, 0.0  ;;  %v1061_v19 = vsel %vm263_vm10, 1.0, %v1181_v18 }
 0x203   :  { %1126 = vset.pattern.permute.xlu2 %v1277_v27 }
 0x204   :  { %1130 = vset.pattern.permute.xlu1 %v1277_v27 }
 0x205   :  { %v1394_v12 = vpop.permute.xlu2 %187  ;;  %v157_v38 = vpop.permute.xlu0 %156 }
 0x206   :  { %vm264_vm11 = vcmp.ge.f32.partialorder %v1380_v8, %v1394_v12  ;;  %vm259_vm6 = vcmp.ge.f32.partialorder %v1312_v52, %v157_v38 }
 0x20b   :  { %658 = vperm.xlu2 %1126, %v647_v3  }
 0x20c   :  { %683 = vperm.xlu1 %1130, %v1353_v62  }
 0x20e   :  { %v1408_v17 = vpop.permute.xlu1 %174 }
 0x20f   :  { %vm262_vm12 = vcmp.ge.f32.partialorder %v1312_v52, %v1408_v17 }
 0x213   :  { %1128 = vset.pattern.permute.xlu2 %v1274_v26 }
 0x214   :  { %1132 = vset.pattern.permute.xlu1 %v1288_v46 }
 0x215   :  { %v1403_v15 = vpop.permute.xlu2 %199  ;;  %v163_v41 = vpop.permute.xlu0 %162 }
 0x216   :  { %vm266_vm13 = vcmp.ge.f32.partialorder %v1380_v8, %v1403_v15  ;;  %vm260_vm9 = vcmp.ge.f32.partialorder %v1312_v52, %v163_v41  ;;  %v1062_v52 = vsel %vm264_vm11, 1.0, %v1181_v18 }
 0x217   :  { %v1064_v23 = vsel %vm266_vm13, 1.0, %v1181_v18  ;;  %v322_v34 = vsel %vm98_vm5, %v1062_v52, 0.0 }
 0x218   :  { %v328_v9 = vsel %vm98_vm5, %v1064_v23, 0.0 }
 0x21b   :  { %664 = vperm.xlu2 %1128, %v647_v3  }
 0x21c   :  { %670 = vperm.xlu1 %1132, %v647_v3  }
 0x21d   :  { %314 = vadd.xlane.f32.xlu0 %v313_v20  ;;  %v319_v20 = vsel %vm98_vm5, %v1061_v19, 0.0 }
 0x21e   :  { %v194_v22 = vpop.permute.xlu1 %193 }
 0x21f   :  { %vm265_vm14 = vcmp.ge.f32.partialorder %v1380_v8, %v194_v22  ;;  %v1058_v22 = vsel %vm260_vm9, 1.0, %v1181_v18 }
 0x220   :  { %v1063_v25 = vsel %vm265_vm14, 1.0, %v1181_v18 }
 0x221   :  { %v325_v29 = vsel %vm98_vm5, %v1063_v25, 0.0  ;;  %v310_v25 = vsel %vm98_vm5, %v1058_v22, 0.0 }
 0x223   :  { %1131 = vset.pattern.permute.xlu2 %v1288_v46 }
 0x224   :  { %1134 = vset.pattern.permute.xlu1 %v1277_v27 }
 0x225   :  { %v1424_v30 = vpop.permute.xlu2 %218  ;;  %326 = vadd.xlane.f32.xlu0 %v325_v29  ;;  %v207_v43 = vpop.permute.xlu0 %206  ;;  %v1060_v29 = vsel %vm262_vm12, 1.0, %v1181_v18 }
 0x226   :  { %vm269_vm15 = vcmp.ge.f32.partialorder %v1421_v28, %v1424_v30  ;;  %vm267_vm13 = vcmp.ge.f32.partialorder %v1421_v28, %v207_v43 }
 0x22b   :  { %645 = vperm.xlu2 %1131, %v1342_v59  }
 0x22c   :  { %708 = vperm.xlu1 %1134, %v1359_v0  }
 0x22e   :  { %v213_v33 = vpop.permute.xlu1 %212 }
 0x22f   :  { %vm268_vm0 = vcmp.ge.f32.partialorder %v1421_v28, %v213_v33  ;;  %v1067_v33 = vsel %vm269_vm15, 1.0, %v1181_v18 }
 0x230   :  { %v1066_v27 = vsel %vm268_vm0, 1.0, %v1181_v18  ;;  %v337_v15 = vsel %vm98_vm5, %v1067_v33, 0.0 }
 0x231   :  { %v334_v35 = vsel %vm98_vm5, %v1066_v27, 0.0  ;;  %v316_v27 = vsel %vm98_vm5, %v1060_v29, 0.0 }
 0x232   :  { %335 = vadd.xlane.f32.xlu0 %v334_v35 }
 0x233   :  { %1133 = vset.pattern.permute.xlu2 %v1274_v26 }
 0x234   :  { %1137 = vset.pattern.permute.xlu1 %v1288_v46 }
 0x235   :  { %v232_v37 = vpop.permute.xlu2 %231  ;;  %v238_v47 = vpop.permute.xlu0 %237 }
 0x236   :  { %vm271_vm1 = vcmp.ge.f32.partialorder %v1440_v36, %v232_v37  ;;  %vm272_vm10 = vcmp.ge.f32.partialorder %v1440_v36, %v238_v47  ;;  %v1065_v37 = vsel %vm267_vm13, 1.0, %v1181_v18 }
 0x237   :  { %v1069_v39 = vsel %vm271_vm1, 1.0, %v1181_v18  ;;  %v1070_v17 = vsel %vm272_vm10, 1.0, %v1181_v18  ;;  %v331_v8 = vsel %vm98_vm5, %v1065_v37, 0.0  ;;  %v1182_v37 = vmov 0  }
 0x238   :  { %v343_v40 = vsel %vm98_vm5, %v1069_v39, 0.0  ;;  %v346_v30 = vsel %vm98_vm5, %v1070_v17, 0.0  ;;  %1140 = vset.pattern.permute.xlu0 %v1182_v37 }
 0x23a   :  { %344 = vadd.xlane.f32.xlu0 %v343_v40 }
 0x23b   :  { %689 = vperm.xlu2 %1133, %v1353_v62  }
 0x23c   :  { %720 = vperm.xlu1 %1137, %v1359_v0   ;;  %v1057_v0 = vsel %vm259_vm6, 1.0, %v1181_v18 }
 0x23d   :  { %v634_v49 = vpop.permute.xlu0 %633  ;;  %v307_v3 = vsel %vm98_vm5, %v1057_v0, 0.0 }
 0x23e   :  { %v1447_v42 = vpop.permute.xlu1 %224  ;;  %vm731_vm14 = vcmp.ge.f32.partialorder %v1342_v59, %v634_v49 }
 0x23f   :  { %vm270_vm2 = vcmp.ge.f32.partialorder %v1421_v28, %v1447_v42  ;;  %v1074_v38 = vsel %vm731_vm14, 1.0, %v1181_v18 }
 0x240   :  { %v781_v40 = vsel %vm98_vm5, %v1074_v38, 0.0  ;;  %v1068_v41 = vsel %vm270_vm2, 1.0, %v1181_v18 }
 0x241   :  { %v340_v43 = vsel %vm98_vm5, %v1068_v41, 0.0 }
 0x243   :  { %1135 = vset.pattern.permute.xlu2 %v1288_v46  ;;  %v619_v46 = vrot.slane %v1339_v58, 1 }
 0x244   :  { %1138 = vset.pattern.permute.xlu1 %v1182_v37 }
 0x245   :  { %v250_v26 = vpop.permute.xlu2 %249  ;;  %v1462_v51 = vperm.slane %v619_v46, 0 }
 0x246   :  { %vm274_vm3 = vcmp.ge.f32.partialorder %v1440_v36, %v250_v26 }
 0x247   :  { %v1072_v44 = vsel %vm274_vm3, 1.0, %v1181_v18 }
 0x248   :  { %v352_v45 = vsel %vm98_vm5, %v1072_v44, 0.0 }
 0x249   :  { %353 = vadd.xlane.f32.xlu0 %v352_v45 }
 0x24b   :  { %695 = vperm.xlu2 %1135, %v1353_v62  }
 0x24d   :  { %v678_v54 = vpop.permute.xlu0 %677 }
 0x24e   :  { %v1456_v48 = vpop.permute.xlu1 %243  ;;  %vm738_vm8 = vcmp.ge.f32.partialorder %v1467_v56, %v678_v54 }
 0x24f   :  { %vm273_vm4 = vcmp.ge.f32.partialorder %v1440_v36, %v1456_v48  ;;  %v1081_v6 = vsel %vm738_vm8, 1.0, %v1181_v18 }
 0x250   :  { %v802_v14 = vsel %vm98_vm5, %v1081_v6, 0.0  ;;  %v1071_v49 = vsel %vm273_vm4, 1.0, %v1181_v18 }
 0x251   :  { %v349_v42 = vsel %vm98_vm5, %v1071_v49, 0.0 }
 0x253   :  { %1139 = vset.pattern.permute.xlu2 %v1182_v37 }
 0x255   :  { %v628_v35 = vpop.permute.xlu2 %627 }
 0x256   :  { %vm730_vm0 = vcmp.ge.f32.partialorder %v1342_v59, %v628_v35 }
 0x257   :  { %v1073_v54 = vsel %vm730_vm0, 1.0, %v1181_v18 }
 0x258   :  { %v778_v36 = vsel %vm98_vm5, %v1073_v54, 0.0 }
 0x25e   :  { %v653_v53 = vpop.permute.xlu1 %652 }
 0x25f   :  { %vm734_vm7 = vcmp.ge.f32.partialorder %v1462_v51, %v653_v53 }
 0x260   :  { %v1077_v55 = vsel %vm734_vm7, 1.0, %v1181_v18 }
 0x261   :  { %v790_v62 = vsel %vm98_vm5, %v1077_v55, 0.0 }
 0x262   :  { %791 = vadd.xlane.f32.xlu0 %v790_v62 }
 0x265   :  { %v659_v12 = vpop.permute.xlu2 %658 }
 0x266   :  { %308 = vadd.xlane.f32.xlu1 %v307_v3  ;;  %vm735_vm2 = vcmp.ge.f32.partialorder %v1462_v51, %v659_v12  ;;  %v621_v3 = vrot.slane %v1339_v58, 3 }
 0x267   :  { %v1078_v0 = vsel %vm735_vm2, 1.0, %v1181_v18 }
 0x268   :  { %v793_v6 = vsel %vm98_vm5, %v1078_v0, 0.0  ;;  %v725_v19 = vperm.slane %v621_v3, 0 }
 0x26a   :  { %803 = vadd.xlane.f32.xlu0 %v802_v14 }
 0x26e   :  { %320 = vadd.xlane.f32.xlu1 %v319_v20  ;;  %v640_v39 = vpop.permute.xlu1 %639 }
 0x26f   :  { %vm732_vm11 = vcmp.ge.f32.partialorder %v1342_v59, %v640_v39 }
 0x270   :  { %v1075_v26 = vsel %vm732_vm11, 1.0, %v1181_v18 }
 0x271   :  { %v784_v47 = vsel %vm98_vm5, %v1075_v26, 0.0 }
 0x274   :  { %311 = vadd.xlane.f32.xlu2 %v310_v25 }
 0x275   :  { %v665_v44 = vpop.permute.xlu2 %664 }
 0x276   :  { %329 = vadd.xlane.f32.xlu1 %v328_v9  ;;  %vm736_vm4 = vcmp.ge.f32.partialorder %v1462_v51, %v665_v44  ;;  %v703_v9 = vpop.permute.xlu0 %702 }
 0x277   :  { %v1079_v58 = vsel %vm736_vm4, 1.0, %v1181_v18  ;;  %vm742_vm8 = vcmp.ge.f32.partialorder %v725_v19, %v703_v9 }
 0x278   :  { %v796_v33 = vsel %vm98_vm5, %v1079_v58, 0.0 }
 0x27c   :  { %317 = vadd.xlane.f32.xlu2 %v316_v27  ;;  %v1085_v27 = vsel %vm742_vm8, 1.0, %v1181_v18 }
 0x27d   :  { %v814_v17 = vsel %vm98_vm5, %v1085_v27, 0.0 }
 0x27e   :  { %338 = vadd.xlane.f32.xlu1 %v337_v15  ;;  %v684_v45 = vpop.permute.xlu1 %683  ;;  %v715_v15 = vpop.permute.xlu0 %714 }
 0x27f   :  { %vm739_vm15 = vcmp.ge.f32.partialorder %v1467_v56, %v684_v45  ;;  %vm744_vm12 = vcmp.ge.f32.partialorder %v725_v19, %v715_v15 }
 0x280   :  { %v1082_v28 = vsel %vm739_vm15, 1.0, %v1181_v18 }
 0x281   :  { %v805_v50 = vsel %vm98_vm5, %v1082_v28, 0.0 }
 0x284   :  { %323 = vadd.xlane.f32.xlu2 %v322_v34 }
 0x285   :  { %v646_v46 = vpop.permute.xlu2 %645 }
 0x286   :  { %347 = vadd.xlane.f32.xlu1 %v346_v30  ;;  %vm733_vm1 = vcmp.ge.f32.partialorder %v1342_v59, %v646_v46  ;;  %v1087_v30 = vsel %vm744_vm12, 1.0, %v1181_v18 }
 0x287   :  { %v1076_v55 = vsel %vm733_vm1, 1.0, %v1181_v18 }
 0x288   :  { %v787_v48 = vsel %vm98_vm5, %v1076_v55, 0.0 }
 0x28c   :  { %332 = vadd.xlane.f32.xlu2 %v331_v8  ;;  %v820_v8 = vsel %vm98_vm5, %v1087_v30, 0.0 }
 0x28e   :  { %782 = vadd.xlane.f32.xlu1 %v781_v40  ;;  %v671_v53 = vpop.permute.xlu1 %670 }
 0x28f   :  { %vm737_vm3 = vcmp.ge.f32.partialorder %v1462_v51, %v671_v53 }
 0x290   :  { %v1080_v59 = vsel %vm737_vm3, 1.0, %v1181_v18  ;;  %v315_v39 = vpop.xlane.xlu0 %314 }
 0x291   :  { %v799_v20 = vsel %vm98_vm5, %v1080_v59, 0.0  ;;  %vm357_vm14 = vcmp.lt.f32.partialorder %v315_v39, 9.0 }
 0x294   :  { %341 = vadd.xlane.f32.xlu2 %v340_v43  ;;  %v490_v43 = vsel %vm357_vm14, %v1399_v13, 0.0 }
 0x295   :  { %v690_v14 = vpop.permute.xlu2 %689 }
 0x296   :  { %785 = vadd.xlane.f32.xlu1 %v784_v47  ;;  %vm740_vm6 = vcmp.ge.f32.partialorder %v1467_v56, %v690_v14 }
 0x297   :  { %v1083_v29 = vsel %vm740_vm6, 1.0, %v1181_v18 }
 0x298   :  { %v808_v51 = vsel %vm98_vm5, %v1083_v29, 0.0 }
 0x29c   :  { %350 = vadd.xlane.f32.xlu2 %v349_v42 }
 0x29e   :  { %806 = vadd.xlane.f32.xlu1 %v805_v50  ;;  %v709_v62 = vpop.permute.xlu1 %708 }
 0x29f   :  { %vm743_vm9 = vcmp.ge.f32.partialorder %v725_v19, %v709_v62 }
 0x2a0   :  { %v1086_v52 = vsel %vm743_vm9, 1.0, %v1181_v18 }
 0x2a1   :  { %v817_v35 = vsel %vm98_vm5, %v1086_v52, 0.0 }
 0x2a4   :  { %779 = vadd.xlane.f32.xlu2 %v778_v36 }
 0x2a5   :  { %v696_v34 = vpop.permute.xlu2 %695 }
 0x2a6   :  { %788 = vadd.xlane.f32.xlu1 %v787_v48  ;;  %vm741_vm10 = vcmp.ge.f32.partialorder %v1467_v56, %v696_v34  ;;  %v327_v56 = vpop.xlane.xlu0 %326 }
 0x2a7   :  { %v1084_v38 = vsel %vm741_vm10, 1.0, %v1181_v18  ;;  %vm361_vm1 = vcmp.lt.f32.partialorder %v327_v56, 9.0 }
 0x2a8   :  { %v811_v12 = vsel %vm98_vm5, %v1084_v38, 0.0  ;;  %v494_v36 = vsel %vm361_vm1, %v1347_v61, 0.0 }
 0x2ac   :  { %794 = vadd.xlane.f32.xlu2 %v793_v6 }
 0x2ae   :  { %v721_v22 = vpop.permute.xlu1 %720  ;;  %800 = vadd.xlane.f32.xlu1 %v799_v20 }
 0x2af   :  { %vm745_vm7 = vcmp.ge.f32.partialorder %v725_v19, %v721_v22 }
 0x2b0   :  { %v1088_v23 = vsel %vm745_vm7, 1.0, %v1181_v18  ;;  %v336_v18 = vpop.xlane.xlu0 %335 }
 0x2b1   :  { %v823_v25 = vsel %vm98_vm5, %v1088_v23, 0.0  ;;  %vm364_vm5 = vcmp.lt.f32.partialorder %v336_v18, 9.0 }
 0x2b2   :  { %824 = vadd.xlane.f32.xlu0 %v823_v25  ;;  %v497_v49 = vsel %vm364_vm5, %v1405_v16, 0.0 }
 0x2b4   :  { %797 = vadd.xlane.f32.xlu2 %v796_v33 }
 0x2b6   :  { %809 = vadd.xlane.f32.xlu1 %v808_v51 }
 0x2b8   :  { %v345_v6 = vpop.xlane.xlu0 %344 }
 0x2b9   :  { %vm367_vm14 = vcmp.lt.f32.partialorder %v345_v6, 9.0 }
 0x2bc   :  { %815 = vadd.xlane.f32.xlu2 %v814_v17 }
 0x2be   :  { %818 = vadd.xlane.f32.xlu1 %v817_v35 }
 0x2c0   :  { %v1573_v22 = vpop.xlane.xlu0 %353 }
 0x2c4   :  { %821 = vadd.xlane.f32.xlu2 %v820_v8 }
 0x2c6   :  { %812 = vadd.xlane.f32.xlu1 %v811_v12 }
 0x2d5   :  { %v792_v9 = vpop.xlane.xlu0 %791 }
 0x2d6   :  { %vm830_vm9 = vcmp.lt.f32.partialorder %v792_v9, 9.0 }
 0x2d7   :  { %v846_v33 = vsel %vm830_vm9, %v1344_v60, 0.0  ;;  %vm370_vm9 = vcmp.lt.f32.partialorder %v1573_v22, 9.0 }
 0x2d9   :  { %v309_v40 = vpop.xlane.xlu1 %308 }
 0x2da   :  { %vm355_vm13 = vcmp.lt.f32.partialorder %v309_v40, 9.0 }
 0x2db   :  { %v488_v41 = vsel %vm355_vm13, %v1365_v2, 0.0 }
 0x2dd   :  { %v804_v38 = vpop.xlane.xlu0 %803 }
 0x2df   :  { %521 = vperm.xlu1 %1138, %v488_v41  }
 0x2e1   :  { %v321_v26 = vpop.xlane.xlu1 %320 }
 0x2e2   :  { %vm359_vm15 = vcmp.lt.f32.partialorder %v321_v26, 9.0  ;;  %v1596_v26 = vand.u32 127, %v152_v24 }
 0x2e3   :  { %v492_v42 = vsel %vm359_vm15, %v1344_v60, 0.0  ;;  %v500_v60 = vsel %vm367_vm14, %v1414_v21, 0.0  ;;  %vm577_vm14 = vcmask 195712  }
 0x2e4   :  { %v579_v6 = vadd.s32 4294967272, %v1596_v26 }
 0x2e7   :  { %527 = vperm.xlu1 %1138, %v490_v43   ;;  %v312_v44 = vpop.xlane.xlu2 %311  ;;  %v1601_v43 = vadd.s32 4294967288, %v1596_v26 }
 0x2e8   :  { %vm356_vm11 = vcmp.lt.f32.partialorder %v312_v44, 9.0 }
 0x2e9   :  { %v489_v45 = vsel %vm356_vm11, %v1334_v57, 0.0  ;;  %v330_v47 = vpop.xlane.xlu1 %329 }
 0x2ea   :  { %524 = vperm.xlu2 %1139, %v489_v45   ;;  %vm362_vm10 = vcmp.lt.f32.partialorder %v330_v47, 9.0  ;;  %v1610_v47 = vadd.s32 4294967280, %v1596_v26 }
 0x2eb   :  { %v495_v27 = vsel %vm362_vm10, %v1387_v10, 0.0  ;;  %vm573_vm10 = vcmask 130112  }
 0x2ef   :  { %548 = vperm.xlu1 %1138, %v497_v49   ;;  %v318_v28 = vpop.xlane.xlu2 %317 }
 0x2f0   :  { %vm358_vm13 = vcmp.lt.f32.partialorder %v318_v28, 9.0 }
 0x2f1   :  { %v339_v46 = vpop.xlane.xlu1 %338  ;;  %v491_v15 = vsel %vm358_vm13, %v1370_v4, 0.0 }
 0x2f2   :  { %533 = vperm.xlu2 %1139, %v492_v42   ;;  %vm365_vm11 = vcmp.lt.f32.partialorder %v339_v46, 9.0 }
 0x2f7   :  { %v324_v50 = vpop.xlane.xlu2 %323 }
 0x2f8   :  { %vm360_vm0 = vcmp.lt.f32.partialorder %v324_v50, 9.0 }
 0x2f9   :  { %v493_v53 = vsel %vm360_vm0, %v1377_v7, 0.0  ;;  %v1563_v54 = vpop.xlane.xlu1 %347 }
 0x2fa   :  { %536 = vperm.xlu2 %1139, %v493_v53   ;;  %vm368_vm15 = vcmp.lt.f32.partialorder %v1563_v54, 9.0 }
 0x2ff   :  { %v333_v55 = vpop.xlane.xlu2 %332 }
 0x300   :  { %vm363_vm2 = vcmp.lt.f32.partialorder %v333_v55, 9.0 }
 0x301   :  { %v496_v48 = vsel %vm363_vm2, %v1355_v63, 0.0  ;;  %v783_v62 = vpop.xlane.xlu1 %782  ;;  %vm834_vm2 = vcmp.lt.f32.partialorder %v804_v38, 9.0 }
 0x302   :  { %vm827_vm3 = vcmp.lt.f32.partialorder %v783_v62, 9.0  ;;  %545 = vperm.xlu0 %1140, %v496_v48   ;;  %539 = vperm.xlu2 %1139, %v494_v36  }
 0x303   :  { %v843_v0 = vsel %vm827_vm3, %v1334_v57, 0.0 }
 0x304   :  { %878 = vperm.xlu1 %1138, %v843_v0  }
 0x307   :  { %v1568_v3 = vpop.xlane.xlu2 %341 }
 0x308   :  { %vm366_vm3 = vcmp.lt.f32.partialorder %v1568_v3, 9.0 }
 0x309   :  { %v786_v59 = vpop.xlane.xlu1 %785  ;;  %v499_v39 = vsel %vm366_vm3, %v1361_v1, 0.0  ;;  %vm930_vm3 = vcmask 458112  }
 0x30a   :  { %vm828_vm4 = vcmp.lt.f32.partialorder %v786_v59, 9.0 }
 0x30b   :  { %v844_v14 = vsel %vm828_vm4, %v1399_v13, 0.0 }
 0x30c   :  { %881 = vperm.xlu0 %1140, %v844_v14  }
 0x30f   :  { %v1571_v19 = vpop.xlane.xlu2 %350 }
 0x310   :  { %vm369_vm4 = vcmp.lt.f32.partialorder %v1571_v19, 9.0 }
 0x311   :  { %v807_v20 = vpop.xlane.xlu1 %806 }
 0x312   :  { %vm835_vm6 = vcmp.lt.f32.partialorder %v807_v20, 9.0 }
 0x313   :  { %v851_v23 = vsel %vm835_vm6, %v1405_v16, 0.0 }
 0x314   :  { %902 = vperm.xlu0 %1140, %v851_v23  }
 0x317   :  { %v780_v58 = vpop.xlane.xlu2 %779 }
 0x318   :  { %vm826_vm7 = vcmp.lt.f32.partialorder %v780_v58, 9.0 }
 0x319   :  { %v842_v57 = vsel %vm826_vm7, %v1365_v2, 0.0  ;;  %v789_v25 = vpop.xlane.xlu1 %788 }
 0x31a   :  { %vm829_vm8 = vcmp.lt.f32.partialorder %v789_v25, 9.0  ;;  %875 = vperm.xlu2 %1139, %v842_v57  }
 0x31b   :  { %v845_v13 = vsel %vm829_vm8, %v1370_v4, 0.0  ;;  %v501_v4 = vsel %vm368_vm15, %v1426_v31, 0.0  ;;  %vm606_vm15 = vcmask 1042434  }
 0x31c   :  { %884 = vperm.xlu0 %1140, %v845_v13  }
 0x31f   :  { %v795_v29 = vpop.xlane.xlu2 %794 }
 0x320   :  { %vm831_vm12 = vcmp.lt.f32.partialorder %v795_v29, 9.0 }
 0x321   :  { %v847_v51 = vsel %vm831_vm12, %v1377_v7, 0.0  ;;  %v801_v16 = vpop.xlane.xlu1 %800  ;;  %v498_v7 = vsel %vm365_vm11, %v1391_v11, 0.0  ;;  %vm581_vm11 = vcmask 261312  }
 0x322   :  { %887 = vperm.xlu2 %1139, %v846_v33   ;;  %890 = vperm.xlu1 %1138, %v847_v51   ;;  %vm833_vm6 = vcmp.lt.f32.partialorder %v801_v16, 9.0 }
 0x323   :  { %v849_v41 = vsel %vm833_vm6, %v1387_v10, 0.0  ;;  %vm961_vm6 = vcmask 519424  }
 0x325   :  { %v825_v45 = vpop.xlane.xlu0 %824 }
 0x326   :  { %vm841_vm13 = vcmp.lt.f32.partialorder %v825_v45, 9.0  ;;  %v965_v45 = vld [vmem:[%s1772_s7 + $0x8] sm:$0xff] }
 0x327   :  { %v798_v2 = vpop.xlane.xlu2 %797  ;;  %v857_v46 = vsel %vm841_vm13, %v1372_v5, 0.0 }
 0x328   :  { %vm832_vm0 = vcmp.lt.f32.partialorder %v798_v2, 9.0  ;;  %v971_v2 = vld [vmem:[%s1772_s7 + $0x38] sm:$0xff] }
 0x329   :  { %v810_v52 = vpop.xlane.xlu1 %809  ;;  %v848_v30 = vsel %vm832_vm0, %v1347_v61, 0.0  ;;  %v502_v61 = vsel %vm369_vm4, %v1432_v32, 0.0  ;;  %988 = vmatpush.msra.mxu2 %v971_v2  ;;  %vm608_vm0 = vcmask 1043459   ;;  %vm934_vm4 = vcmask 523712  }
 0x32a   :  { %530 = vperm.xlu2 %1139, %v491_v15   ;;  %542 = vperm.xlu1 %1138, %v495_v27   ;;  %vm836_vm7 = vcmp.lt.f32.partialorder %v810_v52, 9.0 }
 0x32f   :  { %v816_v17 = vpop.xlane.xlu2 %815 }
 0x330   :  { %vm838_vm5 = vcmp.lt.f32.partialorder %v816_v17, 9.0 }
 0x331   :  { %v854_v34 = vsel %vm838_vm5, %v1414_v21, 0.0  ;;  %v819_v35 = vpop.xlane.xlu1 %818  ;;  %v850_v21 = vsel %vm834_vm2, %v1355_v63, 0.0  ;;  %v852_v63 = vsel %vm836_vm7, %v1391_v11, 0.0  ;;  %v503_v11 = vsel %vm370_vm9, %v1372_v5, 0.0 }
 0x332   :  { %551 = vperm.xlu2 %1139, %v498_v7   ;;  %557 = vperm.xlu1 %1138, %v500_v60   ;;  %vm839_vm8 = vcmp.lt.f32.partialorder %v819_v35, 9.0  ;;  %vm604_vm5 = vcmask 1041409   ;;  %v970_v60 = vld [vmem:[%s1772_s7 + $0x30] sm:$0xff]  ;;  %v969_v35 = vld [vmem:[%s1772_s7 + $0x28] sm:$0xff]  ;;  %vm926_vm2 = vcmask 392512   ;;  %vm976_vm7 = vcmask 523264  }
 0x333   :  { %911 = vperm.xlu0 %1140, %v854_v34   ;;  %989 = vmatpush.msra.mxu2 %v970_v60 }
 0x335   :  { %990 = vmatpush.msra.mxu2 %v969_v35 }
 0x337   :  { %v822_v12 = vpop.xlane.xlu2 %821 }
 0x338   :  { %vm840_vm12 = vcmp.lt.f32.partialorder %v822_v12, 9.0  ;;  %v967_v12 = vld [vmem:[%s1772_s7 + $0x18] sm:$0xff] }
 0x339   :  { %v813_v37 = vpop.xlane.xlu1 %812 }
 0x33a   :  { %vm837_vm1 = vcmp.lt.f32.partialorder %v813_v37, 9.0  ;;  %560 = vperm.xlu2 %1139, %v501_v4   ;;  %893 = vperm.xlu1 %1138, %v848_v30   ;;  %v968_v37 = vld [vmem:[%s1772_s7 + $0x20] sm:$0xff] }
 0x33b   :  { %v853_v8 = vsel %vm837_vm1, %v1361_v1, 0.0  ;;  %v855_v1 = vsel %vm839_vm8, %v1426_v31, 0.0  ;;  %v856_v31 = vsel %vm840_vm12, %v1432_v32, 0.0  ;;  %991 = vmatpush.msra.mxu2 %v968_v37  ;;  %vm611_vm1 = vcmask 257024  }
 0x33c   :  { %908 = vperm.xlu0 %1140, %v853_v8   ;;  %vm1035_vm8 = vcmask 420864  }
 0x33d   :  { %992 = vmatpush.msra.mxu2 %v967_v12  ;;  %v1001_v12 = vld [vmem:[%s1774_s9 + $0x8] sm:$0xff] }
 0x342   :  { %899 = vperm.xlu2 %1139, %v850_v21   ;;  %554 = vperm.xlu1 %1138, %v499_v39   ;;  %v1665_v21 = vadd.s32 4294967264, %v1596_v26  ;;  %v1668_v39 = vadd.s32 4294967256, %v1596_v26 }
 0x344   :  { %v525_v40 = vpop.permute.xlu2 %524 }
 0x345   :  { %v572_v19 = vperm.slane %v525_v40, %v1601_v43 }
 0x34a   :  { %563 = vperm.xlu2 %1139, %v502_v61   ;;  %896 = vperm.xlu1 %1138, %v849_v41  }
 0x34c   :  { %v534_v56 = vpop.permute.xlu2 %533 }
 0x34d   :  { %v583_v10 = vperm.slane %v534_v56, %v1596_v26 }
 0x351   :  { %v522_v50 = vpop.permute.xlu1 %521 }
 0x352   :  { %905 = vperm.xlu2 %1139, %v852_v63   ;;  %914 = vperm.xlu1 %1138, %v855_v1   ;;  %v570_v5 = vperm.slane %v522_v50, %v1596_v26  ;;  %v966_v1 = vld [vmem:[%s1772_s7 + $0x10] sm:$0xff] }
 0x353   :  { %993 = vmatpush.msra.mxu2 %v966_v1 }
 0x354   :  { %v537_v44 = vpop.permute.xlu2 %536  ;;  %v574_v58 = vsel %vm573_vm10, %v572_v19, %v570_v5  ;;  %v1004_v19 = vld [vmem:[%s1774_s9 + $0x20] sm:$0xff] }
 0x355   :  { %v584_v18 = vperm.slane %v537_v44, %v1601_v43  ;;  %994 = vmatpush.msra.mxu2 %v965_v45 }
 0x357   :  { %v585_v24 = vsel %vm573_vm10, %v584_v18, %v583_v10 }
 0x359   :  { %v528_v32 = vpop.permute.xlu1 %527 }
 0x35a   :  { %566 = vperm.xlu2 %1139, %v503_v11   ;;  %917 = vperm.xlu1 %1138, %v856_v31   ;;  %v576_v14 = vperm.slane %v528_v32, %v1610_v47 }
 0x35c   :  { %v540_v49 = vpop.permute.xlu2 %539  ;;  %v578_v25 = vsel %vm577_vm14, %v576_v14, %v574_v58 }
 0x35d   :  { %v586_v28 = vperm.slane %v540_v49, %v1610_v47 }
 0x35f   :  { %v587_v42 = vsel %vm577_vm14, %v586_v28, %v585_v24  ;;  %v1680_v24 = vadd.s32 4294967240, %v1596_v26 }
 0x361   :  { %v549_v55 = vpop.permute.xlu1 %548 }
 0x362   :  { %920 = vperm.xlu2 %1139, %v857_v46   ;;  %v591_v38 = vperm.slane %v549_v55, %v1601_v43  ;;  %v964_v46 = vld [vmem:[%s1772_s7] sm:$0xff]  ;;  %v1006_v55 = vld [vmem:[%s1774_s9 + $0x30] sm:$0xff] }
 0x363   :  { %995 = vmatpush.msra.mxu2 %v964_v46 }
 0x374   :  { %v1615_v53 = vpop.permute.xlu2 %875  ;;  %v546_v59 = vpop.permute.xlu0 %545 }
 0x375   :  { %v590_v7 = vperm.slane %v546_v59, %v1596_v26  ;;  %v923_v49 = vperm.slane %v1615_v53, %v1665_v21  ;;  %v1007_v53 = vld [vmem:[%s1774_s9 + $0x38] sm:$0xff] }
 0x376   :  { %v1619_v48 = vpop.permute.xlu1 %878  ;;  %1023 = vmatpush.msra.mxu3 %v1007_v53 }
 0x377   :  { %v592_v41 = vsel %vm573_vm10, %v591_v38, %v590_v7  ;;  %v925_v28 = vperm.slane %v1619_v48, %v1668_v39 }
 0x378   :  { %1024 = vmatpush.msra.mxu3 %v1006_v55 }
 0x37c   :  { %v1617_v54 = vpop.permute.xlu2 %887 }
 0x37e   :  { %v1634_v33 = vpop.permute.xlu0 %881 }
 0x384   :  { %v531_v36 = vpop.permute.xlu2 %530 }
 0x385   :  { %v580_v20 = vperm.slane %v531_v36, %v579_v6  ;;  %v936_v36 = vperm.slane %v1617_v54, %v1665_v21 }
 0x386   :  { %v1639_v27 = vpop.permute.xlu0 %902 }
 0x387   :  { %v582_v9 = vsel %vm581_vm11, %v580_v20, %v578_v25  ;;  %v1002_v25 = vld [vmem:[%s1774_s9 + $0x10] sm:$0xff] }
 0x38c   :  { %v552_v62 = vpop.permute.xlu2 %551 }
 0x38d   :  { %v593_v4 = vperm.slane %v552_v62, %v1610_v47 }
 0x38e   :  { %v885_v10 = vpop.permute.xlu0 %884 }
 0x38f   :  { %v594_v44 = vsel %vm577_vm14, %v593_v4, %v592_v41  ;;  %v933_v48 = vperm.slane %v885_v10, %v1680_v24  ;;  %v1146_v41 = vld [vmem:[%s1775_s10] ss:$0 sm:$0xff] }
 0x394   :  { %v561_v0 = vpop.permute.xlu2 %560  ;;  %v1621_v3 = vpop.permute.xlu1 %890 }
 0x395   :  { %v598_v34 = vperm.slane %v561_v0, %v1601_v43  ;;  %v1675_v43 = vadd.s32 4294967248, %v1596_v26  ;;  %v1005_v0 = vld [vmem:[%s1774_s9 + $0x28] sm:$0xff] }
 0x396   :  { %1025 = vmatpush.msra.mxu3 %v1005_v0 }
 0x397   :  { %v929_v50 = vperm.slane %v1634_v33, %v1675_v43 }
 0x398   :  { %1026 = vmatpush.msra.mxu3 %v1004_v19 }
 0x39c   :  { %v1627_v22 = vpop.permute.xlu2 %899  ;;  %v543_v23 = vpop.permute.xlu1 %542 }
 0x39d   :  { %v588_v57 = vperm.slane %v543_v23, %v579_v6 }
 0x39f   :  { %v589_v13 = vsel %vm581_vm11, %v588_v57, %v587_v42  ;;  %v1003_v57 = vld [vmem:[%s1774_s9 + $0x18] sm:$0xff] }
 0x3a0   :  { %v605_v29 = vsel %vm604_vm5, %v589_v13, %v582_v9  ;;  %1027 = vmatpush.msra.mxu3 %v1003_v57  ;;  %v943_v13 = vperm.slane %v1627_v22, %v1665_v21 }
 0x3a2   :  { %1028 = vmatpush.msra.mxu3 %v1002_v25 }
 0x3a4   :  { %v564_v51 = vpop.permute.xlu2 %563  ;;  %v558_v16 = vpop.permute.xlu1 %557  ;;  %1029 = vmatpush.msra.mxu3 %v1001_v12 }
 0x3a5   :  { %v597_v17 = vperm.slane %v558_v16, %v1596_v26  ;;  %v600_v30 = vperm.slane %v564_v51, %v1610_v47  ;;  %v937_v26 = vperm.slane %v1621_v3, %v1668_v39  ;;  %v927_v3 = vsel %vm926_vm2, %v925_v28, %v923_v49  ;;  %v912_v5 = vpop.permute.xlu0 %911 }
 0x3a6   :  { %v931_v54 = vsel %vm930_vm3, %v929_v50, %v927_v3  ;;  %v944_v51 = vperm.slane %v1639_v27, %v1668_v39  ;;  %v950_v60 = vperm.slane %v912_v5, %v1665_v21  ;;  %v1000_v21 = vld [vmem:[%s1774_s9] sm:$0xff] }
 0x3a7   :  { %v599_v8 = vsel %vm573_vm10, %v598_v34, %v597_v17  ;;  %v938_v59 = vsel %vm926_vm2, %v937_v26, %v936_v36  ;;  %v935_v20 = vsel %vm934_vm4, %v933_v48, %v931_v54  ;;  %1030 = vmatpush.msra.mxu3 %v1000_v21 }
 0x3a8   :  { %v601_v18 = vsel %vm577_vm14, %v600_v30, %v599_v8  ;;  %v945_v2 = vsel %vm926_vm2, %v944_v51, %v943_v13 }
 0x3ac   :  { %v1641_v15 = vpop.permute.xlu2 %905  ;;  %v1643_v52 = vpop.permute.xlu1 %893 }
 0x3ad   :  { %v939_v32 = vperm.slane %v1643_v52, %v1675_v43 }
 0x3ae   :  { %v909_v33 = vpop.permute.xlu0 %908 }
 0x3af   :  { %v940_v14 = vsel %vm930_vm3, %v939_v32, %v938_v59  ;;  %v948_v52 = vperm.slane %v909_v33, %v1680_v24 }
 0x3b4   :  { %v567_v40 = vpop.permute.xlu2 %566  ;;  %v555_v61 = vpop.permute.xlu1 %554 }
 0x3b5   :  { %v602_v56 = vperm.slane %v567_v40, %v579_v6  ;;  %v595_v63 = vperm.slane %v555_v61, %v579_v6 }
 0x3b7   :  { %v603_v11 = vsel %vm581_vm11, %v602_v56, %v601_v18  ;;  %v596_v31 = vsel %vm581_vm11, %v595_v63, %v594_v44 }
 0x3b8   :  { %v607_v47 = vsel %vm606_vm15, %v596_v31, %v605_v29  ;;  %v946_v29 = vperm.slane %v1641_v15, %v1675_v43 }
 0x3b9   :  { %v609_v42 = vsel %vm608_vm0, %v603_v11, %v607_v47 }
 0x3ba   :  { %612 = vst.msk [vmem:[#allocation2] sm:$0xf] %vm611_vm1, %v609_v42  ;;  %v947_v7 = vsel %vm930_vm3, %v946_v29, %v945_v2 }
 0x3bb   :  { %v949_v27 = vsel %vm934_vm4, %v948_v52, %v947_v7 }
 0x3bc   :  { %v897_v62 = vpop.permute.xlu1 %896  ;;  %v921_v17 = vpop.permute.xlu2 %920 }
 0x3bd   :  { %v941_v6 = vperm.slane %v897_v62, %v1680_v24  ;;  %v955_v15 = vperm.slane %v921_v17, %v1680_v24 }
 0x3bf   :  { %v942_v23 = vsel %vm934_vm4, %v941_v6, %v940_v14 }
 0x3c0   :  { %v957_v58 = vsel %vm604_vm5, %v942_v23, %v935_v20 }
 0x3c1   :  { %v958_v30 = vsel %vm606_vm15, %v949_v27, %v957_v58 }
 0x3c4   :  { %v915_v9 = vpop.permute.xlu1 %914 }
 0x3c5   :  { %v951_v16 = vperm.slane %v915_v9, %v1668_v39  ;;  %v1145_v39 = vld [vmem:[%s1773_s8] ss:$0 sm:$0xff] }
 0x3c7   :  { %v952_v35 = vsel %vm926_vm2, %v951_v16, %v950_v60 }
 0x3cc   :  { %v918_v34 = vpop.permute.xlu1 %917 }
 0x3cd   :  { %v953_v22 = vperm.slane %v918_v34, %v1675_v43 }
 0x3cf   :  { %v954_v4 = vsel %vm930_vm3, %v953_v22, %v952_v35 }
 0x3d0   :  { %v956_v37 = vsel %vm934_vm4, %v955_v15, %v954_v4 }
 0x3d1   :  { %v959_v38 = vsel %vm608_vm0, %v956_v37, %v958_v30 }
 0x3d2   :  { %962 = vst.msk [vmem:[#allocation2] sm:$0xf] %vm961_vm6, %v959_v38 }
 0x3d9   :  { %v963_v8 = vld [vmem:[#allocation2] sm:$0xf] }
 0x3da   :  { %1089 = vmatmul.msk.f32.vlgmr.msra.gmra.mxu2 %vm976_vm7, %v963_v8 }
 0x45d   :  { %v997_v40 = vpop.f32.mrf.mxu2 }
 0x45e   :  { %v998_v61 = vadd.f32 %v1145_v39, %v997_v40 }
 0x460   :  { %1090 = vmatmul.msk.f32.vlgmr.msra.gmra.mxu3 %vm976_vm7, %v998_v61 }
 0x4e3   :  { %v1032_v56 = vpop.f32.mrf.mxu3 }
 0x4e4   :  { %v1033_v63 = vadd.f32 %v1146_v41, %v1032_v56 }
 0x4e6   :  { %1036 = vst.msk [vmem:[#allocation3] sm:$0xf] %vm1035_vm8, %v1033_v63 }
 0x4e7   :  { %1047 = dma.vmem_to_hbm [thread:$0]  %s1043_s23, 64, %s1045_s26, [#allocation4]  }
 0x4e8   :  { %1179 = dma.done.wait [#allocation4], 64  }
 0x4e9   :  { %1180 = vsyncadd [#allocation4], 4294967232 }
 0x4ea   :  { %1052 = vsyncpa [#allocation4], 1 }

</bundles_post_ra>
